<compile_context>
chip_gen: v7x
topology: tpu7x:2x2x1
jax: 0.10.0
libtpu: 0.0.40
codegen_flags: <defaults>
</compile_context>

<pallas_src>
import jax
import jax.numpy as jnp
from jax.experimental import pallas as pl
from jax.experimental.pallas import tpu as pltpu


def _round_up(v, m):
    return ((v + m - 1) // m) * m


def _mlp_kernel(x_ref, w1_ref, b1_ref, w2_ref, b2_ref, o_ref):
    # Cast the streamed f32 node tile to the MXU compute dtype in-kernel
    # (VPU work, hidden under the DMA/MXU); accumulate in f32.
    x = x_ref[...].astype(w1_ref.dtype)
    h = jnp.dot(x, w1_ref[...], preferred_element_type=jnp.float32)
    h = jnp.maximum(h + b1_ref[...], 0.0)
    o = jnp.dot(h.astype(w2_ref.dtype), w2_ref[...],
                preferred_element_type=jnp.float32)
    o_ref[...] = jnp.maximum(o + b2_ref[...], 0.0).astype(o_ref.dtype)


def prepare_params(params, compute_dtype=jnp.bfloat16):
    """Pad (lane-align) + cast the weights ONCE; reuse across forward calls.

    Hidden / output feature dims are zero-padded to multiples of 128 so the
    intermediate and the output are lane-dense; padded rows/cols are zero, so
    they contribute nothing to the valid outputs.
    """
    w1, b1, w2, b2 = params["w1"], params["b1"], params["w2"], params["b2"]
    F_in, H = w1.shape
    H_out = w2.shape[1]
    H_p = _round_up(H, 128)
    Ho_p = _round_up(H_out, 128)
    cd = compute_dtype
    w1p = jnp.zeros((F_in, H_p), cd).at[:, :H].set(w1.astype(cd))
    b1p = jnp.zeros((1, H_p), jnp.float32).at[:, :H].set(
        b1.reshape(1, -1).astype(jnp.float32))
    w2p = jnp.zeros((H_p, Ho_p), cd).at[:H, :H_out].set(w2.astype(cd))
    b2p = jnp.zeros((1, Ho_p), jnp.float32).at[:, :H_out].set(
        b2.reshape(1, -1).astype(jnp.float32))
    return {"w1": w1p, "b1": b1p, "w2": w2p, "b2": b2p, "h_out": H_out}


def _pick_tile_and_vmem(N, F_in, H_p, Ho_p, x_isz, w_isz, o_isz, tile_n_max):
    """Pick the node tile from the VMEM budget (generation-aware)."""
    try:
        vmem_cap = int(pltpu.get_tpu_info().vmem_capacity_bytes)
    except Exception:
        vmem_cap = 64 * 1024 * 1024                      # v7x-safe fallback
    budget = vmem_cap - 16 * 1024 * 1024                 # Mosaic scratch headroom

    # Weights/biases are single-buffered (constant block index).
    weight_bytes = (F_in * H_p + H_p * Ho_p) * w_isz + (H_p + Ho_p) * 4
    per_row = (2 * F_in * x_isz                          # double-buffered x tile
               + 2 * Ho_p * o_isz                        # double-buffered out tile
               + (H_p + Ho_p) * 4                        # f32 intermediates h, o
               + (F_in + H_p) * w_isz)                   # bf16 casts feeding MXU

    tn_fit = max(8, ((budget - weight_bytes) // max(per_row, 1)) // 8 * 8)
    tn = min(tile_n_max, tn_fit)
    # >= 2 grid steps so ("parallel",) can shard across both v7x TensorCores.
    tn = min(tn, max(8, _round_up(pl.cdiv(N, 2), 8)))
    tn = max(8, min(tn, _round_up(N, 8)))

    needed = weight_bytes + tn * per_row
    vmem_limit = int(min(max(int(needed * 1.5), 16 * 1024 * 1024),
                         vmem_cap - 8 * 1024 * 1024))
    # TODO(synk): add a K-tiled fallback (extra "arbitrary" grid axis over H_p
    # with an f32 VMEM accumulator) for hidden sizes whose single-buffered
    # weights exceed the VMEM budget (v7x, 64 MiB).
    return tn, vmem_limit


def mlp_forward(x, edge_index, prepared, *, tile_n=1024, out_dtype=jnp.float32):
    """Pallas implementation of MLP.forward(x, edge_index) == nn(x).

    x: [N, F_in] float32 (streamed as-is, no wrapper-side copy).
    edge_index: ignored (kept for signature parity with the PyTorch module).
    prepared: output of prepare_params() (padded + cast once).
    """
    del edge_index  # unused, matches reference semantics

    w1p, b1p, w2p, b2p = prepared["w1"], prepared["b1"], prepared["w2"], prepared["b2"]
    H_out = prepared["h_out"]
    N, F_in = x.shape
    assert w1p.shape[0] == F_in, (w1p.shape, F_in)
    H_p = w1p.shape[1]
    Ho_p = w2p.shape[1]

    x_isz = jnp.dtype(x.dtype).itemsize
    w_isz = jnp.dtype(w1p.dtype).itemsize
    o_isz = jnp.dtype(out_dtype).itemsize

    tn, vmem_limit = _pick_tile_and_vmem(N, F_in, H_p, Ho_p,
                                         x_isz, w_isz, o_isz, tile_n)

    cost = pl.CostEstimate(
        flops=2 * N * (F_in * H_p + H_p * Ho_p),
        transcendentals=0,
        bytes_accessed=(N * F_in * x_isz                      # x stream (f32)
                        + N * Ho_p * o_isz                    # output stream
                        + (F_in * H_p + H_p * Ho_p) * w_isz   # weights
                        + (H_p + Ho_p) * 4),                  # biases
    )

    grid = (pl.cdiv(N, tn),)
    out = pl.pallas_call(
        _mlp_kernel,
        out_shape=jax.ShapeDtypeStruct((N, Ho_p), out_dtype),
        grid_spec=pltpu.PrefetchScalarGridSpec(
            num_scalar_prefetch=0,
            grid=grid,
            in_specs=[
                # Streamed node tile, native f32 layout (F_in = full dim).
                pl.BlockSpec((tn, F_in), lambda i: (i, 0)),
                # Resident weights/biases: constant block index -> 1 buffer.
                pl.BlockSpec((F_in, H_p), lambda i: (0, 0),
                             pipeline_mode=pl.Buffered(1)),
                pl.BlockSpec((1, H_p), lambda i: (0, 0),
                             pipeline_mode=pl.Buffered(1)),
                pl.BlockSpec((H_p, Ho_p), lambda i: (0, 0),
                             pipeline_mode=pl.Buffered(1)),
                pl.BlockSpec((1, Ho_p), lambda i: (0, 0),
                             pipeline_mode=pl.Buffered(1)),
            ],
            out_specs=pl.BlockSpec((tn, Ho_p), lambda i: (i, 0)),
        ),
        compiler_params=pltpu.CompilerParams(
            dimension_semantics=("parallel",),
            vmem_limit_bytes=vmem_limit),
        cost_estimate=cost,
    )(x, w1p, b1p, w2p, b2p)

    # Only the lane padding (if any) is stripped; node dim is already exact.
    return out if Ho_p == H_out else out[:, :H_out]


def init_params(key, f_in, hidden):
    """Deterministic init mimicking torch.nn.Linear (uniform +/- 1/sqrt(fan_in))."""
    k1, k2, k3, k4 = jax.random.split(key, 4)
    lim1 = 1.0 / jnp.sqrt(f_in)
    lim2 = 1.0 / jnp.sqrt(hidden)
    return {
        "w1": jax.random.uniform(k1, (f_in, hidden), jnp.float32, -lim1, lim1),
        "b1": jax.random.uniform(k2, (1, hidden), jnp.float32, -lim1, lim1),
        "w2": jax.random.uniform(k3, (hidden, hidden), jnp.float32, -lim2, lim2),
        "b2": jax.random.uniform(k4, (1, hidden), jnp.float32, -lim2, lim2),
    }


if __name__ == "__main__":
    key = jax.random.PRNGKey(0)
    kx, ke, kp = jax.random.split(key, 3)

    N, F_IN, HIDDEN = 64, 32, 64          # small synthetic graph: 64 nodes, 32 feats
    x = jax.random.normal(kx, (N, F_IN), jnp.float32)
    # edge_index: [2, E] int32 — unused by the module's forward, provided for parity.
    edge_index = jax.random.randint(ke, (2, 128), 0, N, jnp.int32)

    params = init_params(kp, F_IN, HIDDEN)
    prepared = prepare_params(params)     # pad + cast once, outside the step path

    out = mlp_forward(x, edge_index, prepared)
    out = jax.block_until_ready(out)

    # Pure-JAX f32 reference; kernel uses bf16 MXU operands with f32 accumulation,
    # so compare with a loose tolerance.
    ref = jnp.maximum(x @ params["w1"] + params["b1"], 0.0)
    ref = jnp.maximum(ref @ params["w2"] + params["b2"], 0.0)
    assert out.shape == (N, HIDDEN), out.shape
    assert jnp.allclose(out, ref, atol=5e-2, rtol=5e-2), (
        float(jnp.max(jnp.abs(out - ref))))

    print("KERNEL_OK")
</pallas_src>

<mosaic_0001>
module attributes {stable_mosaic.version = 11 : i64} {
  func.func @_mlp_kernel(%arg0: i32, %arg1: memref<32x32xf32, #tpu.memory_space<vmem>>, %arg2: memref<32x128xbf16, #tpu.memory_space<vmem>>, %arg3: memref<1x128xf32, #tpu.memory_space<vmem>>, %arg4: memref<128x128xbf16, #tpu.memory_space<vmem>>, %arg5: memref<1x128xf32, #tpu.memory_space<vmem>>, %arg6: memref<32x128xf32, #tpu.memory_space<vmem>>) attributes {dimension_semantics = [#tpu.dimension_semantics<parallel>], iteration_bounds = array<i64: 2>, scalar_prefetch = 0 : i64, scratch_operands = 0 : i64, tpu.core_type = #tpu.core_type<tc>, window_params = [{transform_indices = @transform_0, window_bounds = array<i64: 32, 32>}, {pipeline_mode = #tpu.pipeline_mode<synchronous>, transform_indices = @transform_1, window_bounds = array<i64: 32, 128>}, {pipeline_mode = #tpu.pipeline_mode<synchronous>, transform_indices = @transform_2, window_bounds = array<i64: 1, 128>}, {pipeline_mode = #tpu.pipeline_mode<synchronous>, transform_indices = @transform_3, window_bounds = array<i64: 128, 128>}, {pipeline_mode = #tpu.pipeline_mode<synchronous>, transform_indices = @transform_4, window_bounds = array<i64: 1, 128>}, {transform_indices = @transform_5, window_bounds = array<i64: 32, 128>}]} {
    %c0 = arith.constant 0 : index
    %c0_0 = arith.constant 0 : index
    %0 = vector.load %arg1[%c0, %c0_0] : memref<32x32xf32, #tpu.memory_space<vmem>>, vector<32x32xf32>
    %1 = arith.truncf %0 : vector<32x32xf32> to vector<32x32xbf16>
    %c0_1 = arith.constant 0 : index
    %c0_2 = arith.constant 0 : index
    %2 = vector.load %arg2[%c0_1, %c0_2] : memref<32x128xbf16, #tpu.memory_space<vmem>>, vector<32x128xbf16>
    %cst = arith.constant dense<0.000000e+00> : vector<32x128xf32>
    %3 = tpu.matmul %1, %2, %cst {dimension_numbers = #tpu.dot_dimension_numbers<[1], [0], [0], [1], [0, 0, 1, 1], [], []>} : vector<32x32xbf16>, vector<32x128xbf16>, vector<32x128xf32> -> vector<32x128xf32>
    %c0_3 = arith.constant 0 : index
    %c0_4 = arith.constant 0 : index
    %4 = vector.load %arg3[%c0_3, %c0_4] : memref<1x128xf32, #tpu.memory_space<vmem>>, vector<1x128xf32>
    %5 = vector.broadcast %4 : vector<1x128xf32> to vector<32x128xf32>
    %6 = arith.addf %3, %5 : vector<32x128xf32>
    %cst_5 = arith.constant 0.000000e+00 : f32
    %7 = vector.broadcast %cst_5 : f32 to vector<32x128xf32>
    %8 = arith.maximumf %6, %7 : vector<32x128xf32>
    %9 = arith.truncf %8 : vector<32x128xf32> to vector<32x128xbf16>
    %c0_6 = arith.constant 0 : index
    %c0_7 = arith.constant 0 : index
    %10 = vector.load %arg4[%c0_6, %c0_7] : memref<128x128xbf16, #tpu.memory_space<vmem>>, vector<128x128xbf16>
    %cst_8 = arith.constant dense<0.000000e+00> : vector<32x128xf32>
    %11 = tpu.matmul %9, %10, %cst_8 {dimension_numbers = #tpu.dot_dimension_numbers<[1], [0], [0], [1], [0, 0, 1, 1], [], []>} : vector<32x128xbf16>, vector<128x128xbf16>, vector<32x128xf32> -> vector<32x128xf32>
    %c0_9 = arith.constant 0 : index
    %c0_10 = arith.constant 0 : index
    %12 = vector.load %arg5[%c0_9, %c0_10] : memref<1x128xf32, #tpu.memory_space<vmem>>, vector<1x128xf32>
    %13 = vector.broadcast %12 : vector<1x128xf32> to vector<32x128xf32>
    %14 = arith.addf %11, %13 : vector<32x128xf32>
    %cst_11 = arith.constant 0.000000e+00 : f32
    %15 = vector.broadcast %cst_11 : f32 to vector<32x128xf32>
    %16 = arith.maximumf %14, %15 : vector<32x128xf32>
    %c0_12 = arith.constant 0 : index
    %c0_13 = arith.constant 0 : index
    %17 = vector.load %arg6[%c0_12, %c0_13] : memref<32x128xf32, #tpu.memory_space<vmem>>, vector<32x128xf32>
    tpu.vector_store %arg6[%c0_12, %c0_13], %16 {strides = array<i32>} : memref<32x128xf32, #tpu.memory_space<vmem>>, vector<32x128xf32>,
    return
  }
  func.func @transform_0(%arg0: i32) -> (i32, i32) {
    %c0_i32 = arith.constant 0 : i32
    %c0_i32_0 = arith.constant 0 : i32
    return %arg0, %c0_i32 : i32, i32
  }
  func.func @transform_1(%arg0: i32) -> (i32, i32) {
    %c0_i32 = arith.constant 0 : i32
    %c0_i32_0 = arith.constant 0 : i32
    %c0_i32_1 = arith.constant 0 : i32
    return %c0_i32, %c0_i32_0 : i32, i32
  }
  func.func @transform_2(%arg0: i32) -> (i32, i32) {
    %c0_i32 = arith.constant 0 : i32
    %c0_i32_0 = arith.constant 0 : i32
    %c0_i32_1 = arith.constant 0 : i32
    return %c0_i32, %c0_i32_0 : i32, i32
  }
  func.func @transform_3(%arg0: i32) -> (i32, i32) {
    %c0_i32 = arith.constant 0 : i32
    %c0_i32_0 = arith.constant 0 : i32
    %c0_i32_1 = arith.constant 0 : i32
    return %c0_i32, %c0_i32_0 : i32, i32
  }
  func.func @transform_4(%arg0: i32) -> (i32, i32) {
    %c0_i32 = arith.constant 0 : i32
    %c0_i32_0 = arith.constant 0 : i32
    %c0_i32_1 = arith.constant 0 : i32
    return %c0_i32, %c0_i32_0 : i32, i32
  }
  func.func @transform_5(%arg0: i32) -> (i32, i32) {
    %c0_i32 = arith.constant 0 : i32
    %c0_i32_0 = arith.constant 0 : i32
    return %arg0, %c0_i32 : i32, i32
  }
}

</mosaic_0001>

<bundles_post_ra>
// kernel: tpu_custom_call.1
= control target key start
LH: loop header
LB: loop body
LE: loop exit
PB: predicated region body
PF: predicated region fallthrough
CT: control target
= control target key end

     0   :  { %10 = vsyncpa [#allocation3], 0  ;;  %s877_s0 = inlined_call_operand.vmem [shape: f32[64,32], index: 0, kind: input, shape index: {}]   ;;  %s878_s1 = inlined_call_operand.vmem [shape: bf16[32,128], index: 1, kind: input, shape index: {}]   ;;  %s879_s2 = inlined_call_operand.vmem [shape: f32[1,128], index: 2, kind: input, shape index: {}]   ;;  %s880_s3 = inlined_call_operand.vmem [shape: bf16[128,128], index: 3, kind: input, shape index: {}]   ;;  %s881_s4 = inlined_call_operand.vmem [shape: f32[1,128], index: 4, kind: input, shape index: {}]   ;;  %s882_s5 = inlined_call_operand.hbm [shape: f32[64,128], index: 5, kind: output, shape index: {}]  }
   0x1   :  { %12 = vsyncpa [#allocation3 + $0x1], 0  ;;  %s739_s18 = smov 0   ;;  %s741_s19 = smov 0  }
   0x2   :  { %s743_s20 = smov 0   ;;  %s745_s21 = smov 0  }
   0x3 LB: > { %s760_s22 = sadd.s32 4294967295, %s704_s21   ;;  %s522_s23 = sadd.s32 4294967294, %s704_s21   ;;  %s704_s21 = sphi %s745_s21, %s888_s21   ;;  %s700_s20 = sphi %s743_s20, %s887_s20   ;;  %s696_s19 = sphi %s741_s19, %s886_s19   ;;  %s692_s18 = sphi %s739_s18, %s885_s18  }
   0x4   : > { %s764_s24 = sadd.s32 1, %s704_s21   ;;  %s135_s25 = sadd.s32 1, %s700_s20 }
   0x5   : > { %s132_s26 = ssub.s32 %s704_s21, %s764_s24  ;;  %p145_p0 = scmp.ne.s32.totalorder %s700_s20, %s696_s19 }
   0x6   : > { %p133_p1 = scmp.eq.s32.totalorder %s132_s26, 0  ;;  %p146_p2 = scmp.eq.s32.totalorder %s760_s22, 1 }
   0x7   : > { %p151_p3 = scmp.ne.s32.totalorder %s696_s19, %s692_s18  ;;  %p152_p4 = scmp.eq.s32.totalorder %s522_s23, 1 }
   0x8   : > { %s775_s27 = scalar_select %p133_p1, %s700_s20, %s135_s25  }
   0x9   : > { %p777_p5 = por %p146_p2, %p145_p0  ;;  %p781_p6 = por %p152_p4, %p151_p3 }
   0xa   : > { %p525_p7 = scmp.ge.s32.totalorder %s704_s21, 1  ;;  %p191_p8 = scmp.lt.s32.totalorder %s704_s21, 3 }
   0xc   : > { %p192_p9 = pnand %p525_p7, %p191_p8 }
   0xd   : > { %v632_v0 = vld [vmem:[%s878_s1] sm:$0xff] (!%p192_p9)   ;;  %s527_s7 = sshll.u32 (!%p192_p9), %s760_s22, 2  ;;  %v633_v1 = vld [vmem:[%s878_s1 + $0x8] sm:$0xff] (!%p192_p9)   ;;  %v636_v4 = vld [vmem:[%s880_s3 + $0x10] sm:$0xff] (!%p192_p9)   ;;  %vm256_vm0 = vcmask (!%p192_p9), 261120   ;;  %s216_s16 = sand.u32 (!%p192_p9), 1, %s696_s19  }
   0xe   : > { %195 = sbr.rel (%p192_p9) target bundleno = 484 (0x1e4), region = 40  ;;  %p220_p10 = scmp.lt.s32.totalorder (!%p192_p9), %s527_s7, 7  ;;  %563 = vmatprep.subr.bf16.mxu0 (!%p192_p9), %v632_v0  ;;  %v634_v2 = vld [vmem:[%s880_s3] sm:$0xff] (!%p192_p9)   ;;  %v635_v3 = vld [vmem:[%s880_s3 + $0x8] sm:$0xff] (!%p192_p9)   ;;  %v637_v11 = vld [vmem:[%s880_s3 + $0x18] sm:$0xff] (!%p192_p9)  }
   0xf   : > { %564 = vmatpush3.bf16.msra.mxu0 (!%p192_p9), %v632_v0  ;;  %571 = vmatprep.subr.bf16.mxu1 (!%p192_p9), %v634_v2  ;;  %v638_v12 = vld [vmem:[%s880_s3 + $0x20] sm:$0xff] (!%p192_p9)   ;;  %v639_v13 = vld [vmem:[%s880_s3 + $0x28] sm:$0xff] (!%p192_p9)   ;;  %v640_v14 = vld [vmem:[%s880_s3 + $0x30] sm:$0xff] (!%p192_p9)   ;;  %s548_s6 = sshll.u32 (!%p192_p9), %s760_s22, 9  ;;  %s836_s22 = scalar_lea.sflag (!%p192_p9), [#allocation3], %s216_s16 }
  0x10   : > { %565 = vmatprep.subr.bf16.mxu0 (!%p192_p9), %v633_v1  ;;  %572 = vmatpush3.bf16.msra.mxu1 (!%p192_p9), %v634_v2  ;;  %v641_v15 = vld [vmem:[%s880_s3 + $0x38] sm:$0xff] (!%p192_p9)   ;;  %v529_v16 = vld [vmem:[%s879_s2] ss:$0 sm:$0xff] (!%p192_p9)  ;;  %s834_s9 = scalar_lea.hbm (!%p192_p9), %s882_s5, %s548_s6  ;;  %s706_s11 = smov (!%p192_p9), [#allocation2]  }
  0x11   : > { %573 = vmatprep.subr.bf16.mxu1 (!%p192_p9), %v635_v3  ;;  %v534_v31 = vld [vmem:[%s881_s4] ss:$0 sm:$0xff] (!%p192_p9)  ;;  %s646_s12 = sshll.u32 (!%p192_p9), %s706_s11, 4  ;;  %s647_s12 = int_to_ptr.vmem [resolvable:$false] %s646_s12 }
  0x12   : > { %s648_s13 = scalar_lea.vmem (!%p192_p9), %s647_s12, 1024 }
  0x13   : > { %566 = vmatpush3.bf16.msra.mxu0 (!%p192_p9), %v633_v1 }
  0x14   : > { %574 = vmatpush3.bf16.msra.mxu1 (!%p192_p9), %v635_v3 }
  0x15   : > { %s890_s7 = smov (!%p220_p10, %s527_s7), 7  ;;  %575 = vmatprep.subr.bf16.mxu1 %v636_v4 }
  0x16   : > { %s528_s14 = sshll.u32 %s890_s7, 3 }
  0x17   : > { %s223_s17 = scalar_lea.vmem %s877_s0, %s528_s14 }
  0x18   : > { %v227_v5 = vld [vmem:[%s223_s17] sm:$0xff]  ;;  %v228_v6 = vld [vmem:[%s223_s17 + $0x8] sm:$0xff]  ;;  %v229_v7 = vld [vmem:[%s223_s17 + $0x10] sm:$0xff]  ;;  %576 = vmatpush3.bf16.msra.mxu1 %v636_v4 }
  0x19   : > { %v231_v8 = vpack.c.bf16 %v228_v6, %v227_v5  ;;  %v230_v9 = vld [vmem:[%s223_s17 + $0x18] sm:$0xff]  ;;  %577 = vmatprep.subr.bf16.mxu1 %v637_v11  ;;  %s526_s17 = sshll.u32 %s216_s16, 5 }
  0x1a   : > { %v232_v10 = vpack.c.bf16 %v230_v9, %v229_v7  ;;  %s218_s26 = scalar_lea.vmem [#allocation2], %s526_s17 }
  0x1b   : > { %567 = vmatprep.mubr.msk.bf16.mxu0 %vm256_vm0, %v231_v8  ;;  %s460_s30 = sshll.u32 %s218_s26, 4  ;;  %s829_s30 = int_to_ptr.vmem [resolvable:$true] %s460_s30 }
  0x1c   : > { %568 = vmatmul.mubr.msk.bf16.vlgmr.msra.gmra.mrb[0].mxu0 %vm256_vm0, %v232_v10  ;;  %578 = vmatpush3.bf16.msra.mxu1 %v637_v11  ;;  %s642_s10 = scalar_lea.vmem %s829_s30, 512  ;;  %p649_p0 = scmp.lt.s32.totalorder %s829_s30, %s647_s12 }
  0x1d   : > { %579 = vmatprep.subr.bf16.mxu1 %v638_v12  ;;  %p643_p11 = scmp.ne.s32.totalorder %s829_s30, %s642_s10  ;;  %p650_p1 = scmp.lt.s32.totalorder %s648_s13, %s642_s10 }
  0x1f   : > { %p644_p12 = pnand %p643_p11, %p777_p5  ;;  %p651_p2 = por %p650_p1, %p649_p0 }
  0x20   : > { %580 = vmatpush3.bf16.msra.mxu1 %v638_v12 }
  0x21   : > { %581 = vmatprep.subr.bf16.mxu1 %v639_v13  ;;  %p645_p13 = pneg %p644_p12 }
  0x23   : > { %p652_p3 = pnand %p651_p2, %p645_p13 }
  0x24   : > { %582 = vmatpush3.bf16.msra.mxu1 %v639_v13 }
  0x25   : > { %583 = vmatprep.subr.bf16.mxu1 %v640_v14 }
  0x28   : > { %584 = vmatpush3.bf16.msra.mxu1 %v640_v14 }
  0x29   : > { %585 = vmatprep.subr.bf16.mxu1 %v641_v15 }
  0x2c   : > { %586 = vmatpush3.bf16.msra.mxu1 %v641_v15 }
  0xef   : > { %v569_v17 = vpop.f32.mrb[0].mxu0 }
  0xf0   : > { %v306_v18 = vadd.f32 %v569_v17, %v529_v16  ;;  %v297_v19 = vpop.f32.mrb[1].mxu0 }
  0xf1   : > { %v298_v20 = vadd.f32 %v529_v16, %v297_v19  ;;  %v570_v21 = vpop.f32.mrb[2].mxu0 }
  0xf2   : > { %v309_v22 = vadd.f32 %v570_v21, %v529_v16  ;;  %v300_v23 = vpop.f32.mrb[3].mxu0  ;;  %v314_v25 = vmax.f32 %v306_v18, 0.0 }
  0xf3   : > { %v301_v24 = vadd.f32 %v529_v16, %v300_v23  ;;  %v312_v27 = vmax.f32 %v298_v20, 0.0 }
  0xf4   : > { %v315_v26 = vmax.f32 %v309_v22, 0.0 }
  0xf5   : > { %v313_v28 = vmax.f32 %v301_v24, 0.0 }
  0xf6   : > { %v317_v29 = vpack.c.bf16 %v315_v26, %v314_v25 }
  0xf7   : > { %v316_v30 = vpack.c.bf16 %v313_v28, %v312_v27 }
  0xf9   : > { %587 = vmatprep.mubr.bf16.mxu1 %v316_v30 }
  0xfa   : > { %588 = vmatmul.mubr.bf16.vlgmr.msra.gmra.mrb[0].mxu1 %v317_v29 }
 0x1cd   : > { %v589_v32 = vpop.f32.mrb[0].mxu1 }
 0x1ce   : > { %v432_v33 = vadd.f32 %v589_v32, %v534_v31  ;;  %v423_v34 = vpop.f32.mrb[1].mxu1 }
 0x1cf   : > { %v424_v35 = vadd.f32 %v534_v31, %v423_v34  ;;  %v590_v36 = vpop.f32.mrb[2].mxu1 }
 0x1d0   : > { %v440_v37 = vmax.f32 %v432_v33, 0.0  ;;  %v435_v38 = vadd.f32 %v590_v36, %v534_v31  ;;  %v426_v39 = vpop.f32.mrb[3].mxu1 }
 0x1d1   : > { %v438_v40 = vmax.f32 %v424_v35, 0.0  ;;  %v427_v41 = vadd.f32 %v534_v31, %v426_v39 }
 0x1d2   : > { %444 = vst [vmem:[%s218_s26 + $0x10] sm:$0xff] %v440_v37  ;;  %v441_v42 = vmax.f32 %v435_v38, 0.0 }
 0x1d3   : > { %442 = vst [vmem:[%s218_s26] sm:$0xff] %v438_v40  ;;  %v439_v43 = vmax.f32 %v427_v41, 0.0 }
 0x1d4   : > { %445 = vst [vmem:[%s218_s26 + $0x18] sm:$0xff] %v441_v42 }
 0x1d5   : > { %443 = vst [vmem:[%s218_s26 + $0x8] sm:$0xff] %v439_v43 }
 0x1d6   : > { %655 = shalt.err (!%p652_p3)
}
 0x1d7   : > { %s656_s14 = scalar_lea.hbm %s834_s9, 512  ;;  %s660_s17 = scalar_lea.hbm %s882_s5, 1024 }
 0x1d8   : > { %p657_p4 = scmp.ne.s32.totalorder %s834_s9, %s656_s14  ;;  %p661_p9 = scmp.lt.u32.totalorder %s834_s9, %s882_s5 }
 0x1d9   : > { %p662_p10 = scmp.lt.u32.totalorder %s660_s17, %s656_s14  ;;  %p664_p12 = scmp.lt.u32.totalorder %s656_s14, %s834_s9 }
 0x1da   : > { %p658_p7 = pnand %p657_p4, %p777_p5 }
 0x1db   : > { %p663_p11 = por %p662_p10, %p661_p9 }
 0x1dc   : > { %p659_p8 = pneg %p658_p7 }
 0x1dd   : > { %p665_p13 = por %p664_p12, %p663_p11 }
 0x1df   : > { %p666_p0 = pnand %p665_p13, %p659_p8 }
 0x1e1   : > { %669 = shalt.err (!%p666_p0)
}
 0x1e2   : > { %s707_s26 = smov 128   ;;  %s708_s6 = smov 8  }
 0x1e3   : > { %591 = dma.vmem_to_hbm [thread:$0]  (%p777_p5), %s829_s30, 512, %s834_s9, %s836_s22, %s707_s26, %s707_s26, %s708_s6  }
 0x1e4 PF: > { %p597_p1 = scmp.ge.s32.totalorder %s704_s21, 2  ;;  %s475_s7 = sand.u32 1, %s692_s18  }
 0x1e5   : > { %s476_s8 = scalar_lea.sflag [#allocation3], %s475_s7 }
 0x1e6   : > { %p594_p2 = pnand %p597_p1, %p781_p6 }
 0x1e8   : > { %687 = dma.done.wait (!%p594_p2), %s476_s8, 512  }
 0x1e9   : > { %689 = vsyncadd (!%p594_p2), %s476_s8, 4294966784  ;;  %p15_p3 = scmp.ge.s32.totalorder %s764_s24, 4   ;;  %s885_s18 = smov %s696_s19 }
 0x1ea   : > { %s886_s19 = smov %s700_s20  ;;  %s887_s20 = smov %s775_s27 }
 0x1eb   : > { %s888_s21 = smov %s764_s24  ;;  %17 = sbr.rel (!%p15_p3) target bundleno = 3 (0x3), region = 75 }
 0x1f2   :  { %481 = vsyncpa [#allocation3], 1 }
 0x1f3   :  { %483 = vsyncpa [#allocation3 + $0x1], 1 }

</bundles_post_ra>
